<compile_context>
chip_gen: v6e
topology: v6e:2x2x1
jax: 0.10.0
libtpu: 0.0.40
codegen_flags: <defaults>
</compile_context>

<pallas_src>
import jax
import jax.numpy as jnp
from jax import lax
from jax.experimental import pallas as pl
from jax.experimental.pallas import tpu as pltpu


def _rln_kernel(eps):
    def kernel(x_ref, p_ref, out_ref, stats_ref):
        x = x_ref[...].astype(jnp.float32)           # (TB, R, L)
        p = p_ref[...].astype(jnp.float32)           # (R, 2) packed [w, b]

        # Per-sample statistics over (R, L) == (C, H*W); biased variance,
        # eps inside sqrt (matches the PyTorch module exactly).  Two-pass for
        # numerical safety; xc is reused for the output.
        mean = jnp.mean(x, axis=(1, 2), keepdims=True)        # (TB, 1, 1)
        xc = x - mean
        var = jnp.mean(xc * xc, axis=(1, 2), keepdims=True)   # (TB, 1, 1)
        inv_std = lax.rsqrt(var + eps)                        # EUP slot
        std = (var + eps) * inv_std                           # == sqrt(var+eps)

        w = p[:, 0:1]                                         # (R, 1)
        b = p[:, 1:2]                                         # (R, 1)

        # fused normalize + affine: out = xc * (w * inv_std) + b
        out_ref[...] = (xc * (inv_std * w) + b).astype(out_ref.dtype)

        # one tiny per-sample stats block: [:, :, 0] = mean, [:, :, 1] = std
        stats_ref[:, :, 0:1] = mean.astype(stats_ref.dtype)
        stats_ref[:, :, 1:2] = std.astype(stats_ref.dtype)

    return kernel


def _sublane_fold(C, HW, itemsize):
    """Pick hw1 so that (N, C, HW) -> (N, C*hw1, HW//hw1) keeps the lane axis
    a 128-multiple and makes the sublane axis a full packed-sublane multiple.
    Returns 1 (no fold) if C already lines up or no clean factorization."""
    sublanes = 8 * max(1, 4 // max(1, itemsize))   # 8 f32 / 16 bf16 / 32 int8
    if C % sublanes == 0:
        return 1
    for hw1 in range(2, HW + 1):
        if HW % hw1:
            continue
        hw2 = HW // hw1
        if hw2 % 128 == 0 and (C * hw1) % sublanes == 0:
            return hw1
    return 1


def _vmem_capacity_bytes():
    try:
        info = pltpu.get_tpu_info()
        cap = getattr(info, "vmem_capacity_bytes", None)
        if cap:
            return int(cap)
    except Exception:
        pass
    return 64 << 20   # conservative default (v7x per-TC VMEM)


def rln_forward(x, weight, bias, meta1_w, meta1_b, meta2_w, meta2_b, eps=1e-5):
    """x: (N, C, H, W).
    weight/bias: (1, C, 1, 1); meta*_w: (C, 1, 1, 1); meta*_b: (C,).
    Returns (out (N,C,H,W), rescale (N,C,1,1) f32, rebias (N,C,1,1) f32)."""
    N, C, H, W = x.shape
    HW = H * W
    itemsize = x.dtype.itemsize

    # sublane fold: lane axis stays 128-dense, sublane axis fills up
    hw1 = _sublane_fold(C, HW, itemsize)
    R, L = C * hw1, HW // hw1
    x_flat = x.reshape(N, R, L)          # row r <-> channel r // hw1

    # pack weight/bias into one (R, 2) resident array (single small DMA)
    packed = jnp.stack([weight.reshape(C), bias.reshape(C)], axis=1)
    packed = packed.astype(jnp.float32)
    if hw1 > 1:
        packed = jnp.repeat(packed, hw1, axis=0)               # (R, 2)
    param_bytes = int(packed.size) * 4

    # ---- batch-block (tb) sizing --------------------------------------
    sample_f32_bytes = R * L * 4
    target_block_bytes = 4 << 20                                # ~4 MiB f32 x-block
    tb = max(1, min(N, target_block_bytes // max(1, sample_f32_bytes)))
    # keep >=2 grid steps (>=4 when possible): v7x megacore sharding + pipelining
    if N >= 4:
        tb = min(tb, pl.cdiv(N, 4))
    elif N >= 2:
        tb = min(tb, pl.cdiv(N, 2))

    vmem_cap = max((_vmem_capacity_bytes() * 3) // 4, 32 << 20)

    def footprint(tb_):
        xdtype_block = tb_ * R * L * itemsize
        f32_block = tb_ * sample_f32_bytes
        # 2x double-buffered input + 2x double-buffered output (x.dtype)
        # + ~3 full-block f32 temps (x_f32, xc, pre-cast result) + params + slack
        return 4 * xdtype_block + 3 * f32_block + param_bytes + (2 << 20)

    while tb > 1 and footprint(tb) > vmem_cap:
        tb -= 1

    grid = (pl.cdiv(N, tb),)
    vmem_limit = int(min(max(footprint(tb), 32 << 20), vmem_cap))

    out, stats = pl.pallas_call(
        _rln_kernel(eps),
        out_shape=(
            jax.ShapeDtypeStruct((N, R, L), x.dtype),
            jax.ShapeDtypeStruct((N, 1, 2), jnp.float32),
        ),
        grid_spec=pltpu.PrefetchScalarGridSpec(
            num_scalar_prefetch=0,
            grid=grid,
            in_specs=[
                pl.BlockSpec((tb, R, L), lambda n: (n, 0, 0)),
                pl.BlockSpec((R, 2), lambda n: (0, 0)),   # resident packed params
            ],
            out_specs=[
                pl.BlockSpec((tb, R, L), lambda n: (n, 0, 0)),
                pl.BlockSpec((tb, 1, 2), lambda n: (n, 0, 0)),
            ],
        ),
        compiler_params=pltpu.CompilerParams(
            dimension_semantics=("parallel",),    # shards batch blocks on v7x's 2 TCs
            vmem_limit_bytes=vmem_limit,
        ),
    )(x_flat, packed)

    # meta1/meta2 are 1x1 convs (1 -> C) on the (N,1,1,1) std/mean tensors:
    # per-channel scale*stat + bias.  Tiny O(N*C) op; computed in float32 here
    # (fuses trivially in XLA and keeps full precision for bf16 inputs).
    mean = stats[:, 0, 0].reshape(N, 1, 1, 1)
    std = stats[:, 0, 1].reshape(N, 1, 1, 1)
    m1w = meta1_w.reshape(1, C, 1, 1).astype(jnp.float32)
    m1b = meta1_b.reshape(1, C, 1, 1).astype(jnp.float32)
    m2w = meta2_w.reshape(1, C, 1, 1).astype(jnp.float32)
    m2b = meta2_b.reshape(1, C, 1, 1).astype(jnp.float32)
    rescale = m1w * std + m1b
    rebias = m2w * mean + m2b

    return out.reshape(N, C, H, W), rescale, rebias


def _ref_forward(x, weight, bias, meta1_w, meta1_b, meta2_w, meta2_b, eps=1e-5):
    xf = x.astype(jnp.float32)
    mean = jnp.mean(xf, axis=(1, 2, 3), keepdims=True)
    std = jnp.sqrt(jnp.mean((xf - mean) ** 2, axis=(1, 2, 3), keepdims=True) + eps)
    normalized = (xf - mean) / std
    out = (normalized * weight + bias).astype(x.dtype)
    rescale = meta1_w.reshape(1, -1, 1, 1) * std + meta1_b.reshape(1, -1, 1, 1)
    rebias = meta2_w.reshape(1, -1, 1, 1) * mean + meta2_b.reshape(1, -1, 1, 1)
    return out, rescale, rebias


def _check(x, params, atol=3e-5, rtol=1e-5):
    out, rescale, rebias = rln_forward(x, *params)
    jax.block_until_ready((out, rescale, rebias))
    ro, rs, rb = _ref_forward(x, *params)
    assert jnp.allclose(out, ro, atol=atol, rtol=rtol)
    assert jnp.allclose(rescale, rs, atol=atol, rtol=rtol)
    assert jnp.allclose(rebias, rb, atol=atol, rtol=rtol)


if __name__ == "__main__":
    key = jax.random.PRNGKey(0)
    N, C, H, W = 2, 4, 16, 16
    dim = C

    kx, kx2, k1, k2 = jax.random.split(key, 4)
    x = jax.random.normal(kx, (N, C, H, W), dtype=jnp.float32)

    # deterministic parameter init (mirrors shapes in RLN.__init__)
    weight = jnp.ones((1, dim, 1, 1), dtype=jnp.float32)
    bias = jnp.zeros((1, dim, 1, 1), dtype=jnp.float32)
    meta1_w = 0.02 * jax.random.truncated_normal(k1, -2.0, 2.0, (dim, 1, 1, 1), jnp.float32)
    meta1_b = jnp.ones((dim,), dtype=jnp.float32)
    meta2_w = 0.02 * jax.random.truncated_normal(k2, -2.0, 2.0, (dim, 1, 1, 1), jnp.float32)
    meta2_b = jnp.zeros((dim,), dtype=jnp.float32)
    params = (weight, bias, meta1_w, meta1_b, meta2_w, meta2_b)

    # main check (even N: full batch blocks)
    _check(x, params)

    # odd N exercises the cdiv / partial-last-block + masked-writeback path
    x_odd = jax.random.normal(kx2, (3, C, H, W), dtype=jnp.float32)
    _check(x_odd, params)

    print("KERNEL_OK")
</pallas_src>

<mosaic_0001>
module attributes {stable_mosaic.version = 11 : i64} {
  func.func @kernel(%arg0: i32, %arg1: memref<1x8x128xf32, #tpu.memory_space<vmem>>, %arg2: memref<8x2xf32, #tpu.memory_space<vmem>>, %arg3: memref<1x8x128xf32, #tpu.memory_space<vmem>>, %arg4: memref<1x1x2xf32, #tpu.memory_space<vmem>>) attributes {dimension_semantics = [#tpu.dimension_semantics<parallel>], iteration_bounds = array<i64: 2>, scalar_prefetch = 0 : i64, scratch_operands = 0 : i64, tpu.core_type = #tpu.core_type<tc>, window_params = [{transform_indices = @transform_0, window_bounds = array<i64: 1, 8, 128>}, {pipeline_mode = #tpu.pipeline_mode<synchronous>, transform_indices = @transform_1, window_bounds = array<i64: 8, 2>}, {transform_indices = @transform_2, window_bounds = array<i64: 1, 8, 128>}, {transform_indices = @transform_3, window_bounds = array<i64: 1, 1, 2>}]} {
    %c0 = arith.constant 0 : index
    %c0_0 = arith.constant 0 : index
    %c0_1 = arith.constant 0 : index
    %0 = vector.load %arg1[%c0, %c0_0, %c0_1] : memref<1x8x128xf32, #tpu.memory_space<vmem>>, vector<1x8x128xf32>
    %c0_2 = arith.constant 0 : index
    %c0_3 = arith.constant 0 : index
    %1 = vector.load %arg2[%c0_2, %c0_3] : memref<8x2xf32, #tpu.memory_space<vmem>>, vector<8x2xf32>
    %cst = arith.constant dense<0.000000e+00> : vector<1xf32>
    %2 = vector.multi_reduction <add>, %0, %cst [1, 2] : vector<1x8x128xf32> to vector<1xf32>
    %3 = vector.shape_cast %2 : vector<1xf32> to vector<1x1x1xf32>
    %cst_4 = arith.constant 1.024000e+03 : f32
    %4 = vector.broadcast %cst_4 : f32 to vector<1x1x1xf32>
    %5 = arith.divf %3, %4 : vector<1x1x1xf32>
    %6 = vector.broadcast %5 : vector<1x1x1xf32> to vector<1x8x128xf32>
    %7 = arith.subf %0, %6 : vector<1x8x128xf32>
    %8 = arith.mulf %7, %7 : vector<1x8x128xf32>
    %cst_5 = arith.constant dense<0.000000e+00> : vector<1xf32>
    %9 = vector.multi_reduction <add>, %8, %cst_5 [1, 2] : vector<1x8x128xf32> to vector<1xf32>
    %10 = vector.shape_cast %9 : vector<1xf32> to vector<1x1x1xf32>
    %cst_6 = arith.constant 1.024000e+03 : f32
    %11 = vector.broadcast %cst_6 : f32 to vector<1x1x1xf32>
    %12 = arith.divf %10, %11 : vector<1x1x1xf32>
    %cst_7 = arith.constant 9.99999974E-6 : f32
    %13 = vector.broadcast %cst_7 : f32 to vector<1x1x1xf32>
    %14 = arith.addf %12, %13 : vector<1x1x1xf32>
    %15 = math.rsqrt %14 : vector<1x1x1xf32>
    %cst_8 = arith.constant 9.99999974E-6 : f32
    %16 = vector.broadcast %cst_8 : f32 to vector<1x1x1xf32>
    %17 = arith.addf %12, %16 : vector<1x1x1xf32>
    %18 = arith.mulf %17, %15 : vector<1x1x1xf32>
    %19 = vector.extract_strided_slice %1 {offsets = [0, 0], sizes = [8, 1], strides = [1, 1]} : vector<8x2xf32> to vector<8x1xf32>
    %20 = vector.extract_strided_slice %1 {offsets = [0, 1], sizes = [8, 1], strides = [1, 1]} : vector<8x2xf32> to vector<8x1xf32>
    %21 = vector.shape_cast %19 : vector<8x1xf32> to vector<1x8x1xf32>
    %22 = vector.broadcast %15 : vector<1x1x1xf32> to vector<1x8x1xf32>
    %23 = arith.mulf %22, %21 : vector<1x8x1xf32>
    %24 = vector.broadcast %23 : vector<1x8x1xf32> to vector<1x8x128xf32>
    %25 = arith.mulf %7, %24 : vector<1x8x128xf32>
    %26 = vector.shape_cast %20 : vector<8x1xf32> to vector<1x8x1xf32>
    %27 = vector.broadcast %26 : vector<1x8x1xf32> to vector<1x8x128xf32>
    %28 = arith.addf %25, %27 : vector<1x8x128xf32>
    %c0_9 = arith.constant 0 : index
    %c0_10 = arith.constant 0 : index
    %c0_11 = arith.constant 0 : index
    %29 = vector.load %arg3[%c0_9, %c0_10, %c0_11] : memref<1x8x128xf32, #tpu.memory_space<vmem>>, vector<1x8x128xf32>
    tpu.vector_store %arg3[%c0_9, %c0_10, %c0_11], %28 {strides = array<i32>} : memref<1x8x128xf32, #tpu.memory_space<vmem>>, vector<1x8x128xf32>,
    %c0_12 = arith.constant 0 : index
    %c0_13 = arith.constant 0 : index
    %c0_14 = arith.constant 0 : index
    %30 = vector.load %arg4[%c0_12, %c0_13, %c0_14] : memref<1x1x2xf32, #tpu.memory_space<vmem>>, vector<1x1x1xf32>
    tpu.vector_store %arg4[%c0_12, %c0_13, %c0_14], %5 {strides = array<i32>} : memref<1x1x2xf32, #tpu.memory_space<vmem>>, vector<1x1x1xf32>,
    %c0_15 = arith.constant 0 : index
    %c0_16 = arith.constant 0 : index
    %c1 = arith.constant 1 : index
    %31 = vector.load %arg4[%c0_15, %c0_16, %c1] : memref<1x1x2xf32, #tpu.memory_space<vmem>>, vector<1x1x1xf32>
    tpu.vector_store %arg4[%c0_15, %c0_16, %c1], %18 {strides = array<i32>} : memref<1x1x2xf32, #tpu.memory_space<vmem>>, vector<1x1x1xf32>,
    return
  }
  func.func @transform_0(%arg0: i32) -> (i32, i32, i32) {
    %c0_i32 = arith.constant 0 : i32
    %c0_i32_0 = arith.constant 0 : i32
    %c0_i32_1 = arith.constant 0 : i32
    return %arg0, %c0_i32, %c0_i32_0 : i32, i32, i32
  }
  func.func @transform_1(%arg0: i32) -> (i32, i32) {
    %c0_i32 = arith.constant 0 : i32
    %c0_i32_0 = arith.constant 0 : i32
    %c0_i32_1 = arith.constant 0 : i32
    return %c0_i32, %c0_i32_0 : i32, i32
  }
  func.func @transform_2(%arg0: i32) -> (i32, i32, i32) {
    %c0_i32 = arith.constant 0 : i32
    %c0_i32_0 = arith.constant 0 : i32
    %c0_i32_1 = arith.constant 0 : i32
    return %arg0, %c0_i32, %c0_i32_0 : i32, i32, i32
  }
  func.func @transform_3(%arg0: i32) -> (i32, i32, i32) {
    %c0_i32 = arith.constant 0 : i32
    %c0_i32_0 = arith.constant 0 : i32
    %c0_i32_1 = arith.constant 0 : i32
    return %arg0, %c0_i32, %c0_i32_0 : i32, i32, i32
  }
}

</mosaic_0001>

<bundles_post_ra>
// kernel: tpu_custom_call.1
= control target key start
LH: loop header
LB: loop body
LE: loop exit
PB: predicated region body
PF: predicated region fallthrough
CT: control target
= control target key end

     0   :  { %9 = vsyncpa [#allocation3], 0  ;;  %s760_s0 = inlined_call_operand.hbm [shape: f32[2,8,128], index: 0, kind: input, shape index: {}]   ;;  %s761_s1 = inlined_call_operand.vmem [shape: f32[8,2], index: 1, kind: input, shape index: {}]   ;;  %s762_s2 = inlined_call_operand.hbm [shape: f32[2,8,128], index: 2, kind: output, shape index: {0}]   ;;  %s763_s3 = inlined_call_operand.hbm [shape: f32[2,1,2], index: 3, kind: output, shape index: {1}]  }
   0x1   :  { %11 = vsyncpa [#allocation3 + $0x1], 0 }
   0x2   :  { %12 = vsyncpa [#allocation4], 0 }
   0x3   :  { %14 = vsyncpa [#allocation4 + $0x1], 0 }
   0x4   :  { %15 = vsyncpa [#allocation7], 0 }
   0x5   :  { %17 = vsyncpa [#allocation7 + $0x1], 0  ;;  %s589_s12 = smov 0   ;;  %s591_s13 = smov 0  }
   0x6   :  { %s593_s14 = smov 0   ;;  %s595_s15 = smov 0  }
   0x7 LB: > { %s610_s16 = sadd.s32 4294967295, %s562_s15   ;;  %s369_s17 = sadd.s32 4294967294, %s562_s15   ;;  %s562_s15 = sphi %s595_s15, %s780_s15   ;;  %s558_s14 = sphi %s593_s14, %s779_s14   ;;  %s554_s13 = sphi %s591_s13, %s778_s13   ;;  %s550_s12 = sphi %s589_s12, %s777_s12  }
   0x8   : > { %s614_s18 = sadd.s32 1, %s562_s15   ;;  %s30_s19 = sadd.s32 1, %s558_s14 }
   0x9   : > { %s27_s20 = ssub.s32 %s562_s15, %s614_s18  ;;  %p37_p0 = scmp.ne.s32.totalorder %s558_s14, %s554_s13 }
   0xa   : > { %p28_p1 = scmp.eq.s32.totalorder %s27_s20, 0  ;;  %p38_p2 = scmp.eq.s32.totalorder %s562_s15, 0 }
   0xb   : > { %p43_p3 = scmp.ne.s32.totalorder %s554_s13, %s550_s12  ;;  %p44_p4 = scmp.eq.s32.totalorder %s610_s16, 0 }
   0xc   : > { %s626_s21 = scalar_select %p28_p1, %s558_s14, %s30_s19  }
   0xd   : > { %p628_p5 = por %p38_p2, %p37_p0  ;;  %p632_p6 = por %p44_p4, %p43_p3 }
   0xe   : > { %p88_p7 = scmp.eq.s32.totalorder %s610_s16, 1  ;;  %p94_p8 = scmp.eq.s32.totalorder %s369_s17, 1 }
   0xf   : > { %s767_s23 = scalar_select %p632_p6, 1, 0 }
  0x10   : > { %p399_p10 = scmp.lt.s32.totalorder %s562_s15, 2  ;;  %p639_p11 = por %p88_p7, %p37_p0 }
  0x11   : > { %p643_p12 = por %p94_p8, %p43_p3  ;;  %s143_s26 = sand.u32 1, %s558_s14  }
  0x12   : > { %s768_s24 = scalar_select %p639_p11, 1, 0 }
  0x13   : > { %s769_s25 = scalar_select %p643_p12, 1, 0 }
  0x14   : > { %s373_s27 = sshll.u32 %s562_s15, 7  ;;  %s372_s28 = sshll.u32 %s143_s26, 3 }
  0x15   : > { %s652_s4 = scalar_lea.hbm %s760_s0, %s373_s27  ;;  %s147_s5 = scalar_lea.vmem [#allocation2], %s372_s28 }
  0x16   : > { %s154_s6 = sshll.u32 %s147_s5, 4  ;;  %p656_p13 = pnand %p399_p10, %p628_p5  ;;  %s660_s6 = int_to_ptr.vmem [resolvable:$true] %s154_s6 }
  0x17   : > { %s144_s8 = scalar_lea.sflag [#allocation3], %s143_s26  ;;  %s440_s9 = scalar_lea.hbm %s652_s4, 128 }
  0x18   : > { %p441_p2 = scmp.ne.s32.totalorder %s652_s4, %s440_s9  ;;  %p442_p3 = pneg %p656_p13 }
  0x19   : > { %s445_s17 = scalar_lea.hbm %s760_s0, 256  ;;  %p446_p5 = scmp.lt.s32.totalorder %s652_s4, %s760_s0 }
  0x1a   : > { %p443_p4 = pnand %p442_p3, %p441_p2  ;;  %p447_p8 = scmp.lt.s32.totalorder %s445_s17, %s440_s9 }
  0x1c   : > { %p444_p7 = pneg %p443_p4  ;;  %p448_p10 = por %p447_p8, %p446_p5 }
  0x1e   : > { %p449_p9 = pnand %p448_p10, %p444_p7 }
  0x20   : > { %452 = shalt.err (!%p449_p9)
}
  0x21   : > { %s453_s22 = scalar_lea.vmem %s660_s6, 128  ;;  %s564_s26 = smov [#allocation2]  }
  0x22   : > { %p454_p0 = scmp.ne.s32.totalorder %s660_s6, %s453_s22  ;;  %s458_s27 = sshll.u32 %s564_s26, 4  ;;  %s459_s27 = int_to_ptr.vmem [resolvable:$false] %s458_s27 }
  0x23   : > { %s460_s28 = scalar_lea.vmem %s459_s27, 256  ;;  %p461_p4 = scmp.lt.s32.totalorder %s660_s6, %s459_s27 }
  0x24   : > { %p456_p1 = pnand %p454_p0, %p442_p3  ;;  %p462_p12 = scmp.lt.s32.totalorder %s460_s28, %s453_s22 }
  0x26   : > { %p457_p2 = pneg %p456_p1  ;;  %p463_p11 = por %p462_p12, %p461_p4 }
  0x28   : > { %p464_p6 = pnand %p463_p11, %p457_p2 }
  0x2a   : > { %467 = shalt.err (!%p464_p6)
}
  0x2b   : > { %391 = dma.hbm_to_vmem [thread:$0]  (!%p656_p13), %s652_s4, 128, %s660_s6, %s144_s8  }
  0x2c   : > { %p771_p9 = scmp.lt.s32.totalorder %s562_s15, 3  ;;  %p772_p7 = scmp.ge.s32.totalorder %s562_s15, 1 }
  0x2e   : > { %p160_p0 = pnand %p772_p7, %p771_p9 }
  0x2f   : > { %s687_s29 = sand.u32 (!%p160_p0), 1, %s554_s13   ;;  %p773_p6 = scmp.ne.s32.totalorder (!%p160_p0), %s767_s23, 0 }
  0x30   : > { %163 = sbr.rel (%p160_p0) target bundleno = 525 (0x20d), region = 28  ;;  %s375_s30 = sshll.u32 (!%p160_p0), %s687_s29, 3 }
  0x31   : > { %s166_s5 = scalar_lea.sflag (!%p160_p0), [#allocation3], %s687_s29  ;;  %s169_s7 = scalar_lea.vmem (!%p160_p0), [#allocation2], %s375_s30 }
  0x35   : > { %537 = dma.done.wait (%p773_p6), %s166_s5, 128  }
  0x36   : > { %539 = vsyncadd (%p773_p6), %s166_s5, 4294967168  ;;  %v196_v0 = vld [vmem:[%s169_s7] sm:$0xff]  ;;  %vm236_vm0 = vcmask 0   ;;  %s698_s4 = scalar_lea.vmem [#allocation6], %s687_s29  ;;  %v565_v11 = vmov 0   ;;  %v566_v12 = vmov 1  }
  0x37   : > { %198 = vadd.xlane.f32.xlu0 %v196_v0  ;;  %435 = vset.pattern.permute.xlu1 %v565_v11  ;;  %v197_v22 = vld [vmem:[%s761_s1] sm:$0xff]  ;;  %vm238_vm1 = vcmask 8200   ;;  %s379_s8 = sshll.u32 %s610_s16, 4  ;;  %s271_s9 = sshll.u32 %s698_s4, 4  ;;  %s272_s9 = int_to_ptr.vmem [resolvable:$true] %s271_s9 }
  0x38   : > { %437 = vset.pattern.permute.xlu0 %v566_v12  ;;  %s269_s17 = scalar_lea.hbm %s763_s3, %s379_s8  ;;  %s246_s19 = scalar_lea.sflag [#allocation7], %s687_s29 }
  0x39   : > { %s468_s20 = scalar_lea.vmem %s272_s9, 16  ;;  %p774_p12 = scmp.ne.s32.totalorder %s768_s24, 0 }
  0x3a   : > { %p469_p11 = scmp.ne.s32.totalorder %s272_s9, %s468_s20  ;;  %s567_s22 = smov [#allocation6]  }
  0x3b   : > { %s472_s26 = sshll.u32 %s567_s22, 4  ;;  %s473_s26 = int_to_ptr.vmem [resolvable:$false] %s472_s26 }
  0x3c   : > { %p470_p13 = pnand %p469_p11, %p774_p12  ;;  %s474_s27 = scalar_lea.vmem %s473_s26, 32 }
  0x3d   : > { %p475_p3 = scmp.lt.s32.totalorder %s272_s9, %s473_s26  ;;  %p476_p5 = scmp.lt.s32.totalorder %s474_s27, %s468_s20 }
  0x3e   : > { %p471_p1 = pneg %p470_p13 }
  0x3f   : > { %p477_p8 = por %p476_p5, %p475_p3 }
  0x41   : > { %p478_p10 = pnand %p477_p8, %p471_p1 }
  0xc0   : > { %v199_v1 = vpop.xlane.xlu0 %198 }
  0xc1   : > { %v200_v2 = vrot.slane %v199_v1, 4 }
  0xc3   : > { %v201_v3 = vadd.f32 %v200_v2, %v199_v1 }
  0xc5   : > { %v202_v4 = vrot.slane %v201_v3, 2 }
  0xc7   : > { %v203_v5 = vadd.f32 %v202_v4, %v201_v3 }
  0xc9   : > { %v204_v6 = vrot.slane %v203_v5, 1 }
  0xcb   : > { %v205_v7 = vadd.f32 %v204_v6, %v203_v5 }
  0xcd   : > { %v207_v8 = vmul.f32 0.0009765625, %v205_v7 }
  0xcf   : > { %v208_v9 = vsub.f32 %v196_v0, %v207_v8  ;;  %237 = vst.msk [vmem:[%s698_s4] sm:$0x1] %vm236_vm0, %v207_v8 }
  0xd1   : > { %v209_v10 = vmul.f32 %v208_v9, %v208_v9 }
  0xd3   : > { %210 = vadd.xlane.f32.xlu0 %v209_v10 }
 0x15c   : > { %v211_v13 = vpop.xlane.xlu0 %210 }
 0x15d   : > { %v212_v14 = vrot.slane %v211_v13, 4 }
 0x15f   : > { %v213_v15 = vadd.f32 %v212_v14, %v211_v13 }
 0x161   : > { %v214_v16 = vrot.slane %v213_v15, 2 }
 0x163   : > { %v215_v17 = vadd.f32 %v214_v16, %v213_v15 }
 0x165   : > { %v216_v18 = vrot.slane %v215_v17, 1 }
 0x167   : > { %v217_v19 = vadd.f32 %v216_v18, %v215_v17 }
 0x169   : > { %v218_v20 = vmul.f32 0.0009765625, %v217_v19 }
 0x16b   : > { %v219_v21 = vadd.f32 1e-05, %v218_v20 }
 0x16d   : > { %438 = vrsqrt.f32 %v219_v21 }
 0x17a   : > { %v439_v23 = vpop.eup %438 }
 0x17b   : > { %v221_v24 = vmul.f32 %v439_v23, %v219_v21  ;;  %v222_v25 = vmul.f32 %v439_v23, %v197_v22 }
 0x17d   : > { %225 = vperm.xlu1 %435, %v222_v25   ;;  %239 = vst.msk [vmem:[%s698_s4] sm:$0x1] %vm238_vm1, %v221_v24 }
 0x181   : > { %436 = vset.pattern.permute.xlu1 %v566_v12 }
 0x182   : > { %231 = vperm.xlu1 %436, %v197_v22  }
 0x183   : > { %481 = shalt.err (!%p478_p10)
}
 0x184   : > { %s482_s28 = scalar_lea.hbm %s269_s17, 16  ;;  %s486_s4 = scalar_lea.hbm %s763_s3, 32 }
 0x185   : > { %p483_p2 = scmp.ne.s32.totalorder %s269_s17, %s482_s28  ;;  %p487_p7 = scmp.lt.s32.totalorder %s269_s17, %s763_s3 }
 0x186   : > { %p488_p0 = scmp.lt.s32.totalorder %s486_s4, %s482_s28 }
 0x187   : > { %p484_p4 = pnand %p483_p2, %p774_p12 }
 0x188   : > { %p489_p6 = por %p488_p0, %p487_p7 }
 0x189   : > { %p485_p9 = pneg %p484_p4 }
 0x18b   : > { %p490_p11 = pnand %p489_p6, %p485_p9 }
 0x18d   : > { %493 = shalt.err (!%p490_p11)
}
 0x18e   : > { %385 = dma.vmem_to_hbm [thread:$0]  (%p774_p12), %s272_s9, 16, %s269_s17, %s246_s19  }
 0x18f   : > { %s378_s8 = sshll.u32 %s610_s16, 7  ;;  %s189_s10 = scalar_lea.vmem [#allocation5], %s375_s30 }
 0x190   : > { %s258_s11 = sshll.u32 %s189_s10, 4  ;;  %s256_s26 = scalar_lea.hbm %s762_s2, %s378_s8  ;;  %s259_s11 = int_to_ptr.vmem [resolvable:$true] %s258_s11 }
 0x191   : > { %s241_s27 = scalar_lea.sflag [#allocation4], %s687_s29  ;;  %s494_s28 = scalar_lea.vmem %s259_s11, 128 }
 0x192   : > { %p495_p13 = scmp.ne.s32.totalorder %s259_s11, %s494_s28  ;;  %s568_s9 = smov [#allocation5]  }
 0x193   : > { %s498_s16 = sshll.u32 %s568_s9, 4  ;;  %s499_s16 = int_to_ptr.vmem [resolvable:$false] %s498_s16 }
 0x194   : > { %p496_p1 = pnand %p495_p13, %p774_p12  ;;  %s500_s30 = scalar_lea.vmem %s499_s16, 256 }
 0x195   : > { %p501_p5 = scmp.lt.s32.totalorder %s259_s11, %s499_s16  ;;  %p502_p8 = scmp.lt.s32.totalorder %s500_s30, %s494_s28 }
 0x196   : > { %p497_p3 = pneg %p496_p1 }
 0x197   : > { %p503_p10 = por %p502_p8, %p501_p5 }
 0x199   : > { %p504_p2 = pnand %p503_p10, %p497_p3 }
 0x1f8   : > { %v226_v26 = vpop.permute.xlu1 %225 }
 0x1f9   : > { %v228_v27 = vmul.f32 %v226_v26, %v208_v9 }
 0x1fd   : > { %v232_v28 = vpop.permute.xlu1 %231 }
 0x1fe   : > { %v234_v29 = vadd.f32 %v232_v28, %v228_v27 }
 0x200   : > { %235 = vst [vmem:[%s189_s10] sm:$0xff] %v234_v29 }
 0x201   : > { %507 = shalt.err (!%p504_p2)
}
 0x202   : > { %s508_s17 = scalar_lea.hbm %s256_s26, 128  ;;  %s512_s5 = scalar_lea.hbm %s762_s2, 256 }
 0x203   : > { %p509_p4 = scmp.ne.s32.totalorder %s256_s26, %s508_s17  ;;  %p513_p0 = scmp.lt.s32.totalorder %s256_s26, %s762_s2 }
 0x204   : > { %p514_p6 = scmp.lt.s32.totalorder %s512_s5, %s508_s17 }
 0x205   : > { %p510_p9 = pnand %p509_p4, %p774_p12 }
 0x206   : > { %p515_p11 = por %p514_p6, %p513_p0 }
 0x207   : > { %p511_p7 = pneg %p510_p9 }
 0x209   : > { %p516_p13 = pnand %p515_p11, %p511_p7 }
 0x20b   : > { %519 = shalt.err (!%p516_p13)
}
 0x20c   : > { %384 = dma.vmem_to_hbm [thread:$0]  (%p774_p12), %s259_s11, 128, %s256_s26, %s241_s27  }
 0x20d PF: > { %s283_s23 = sand.u32 1, %s550_s12   ;;  %p775_p1 = scmp.ne.s32.totalorder %s769_s25, 0 }
 0x20e   : > { %p776_p3 = scmp.ge.s32.totalorder %s562_s15, 2  ;;  %s284_s6 = scalar_lea.sflag [#allocation4], %s283_s23 }
 0x210   : > { %p393_p5 = pnand %p776_p3, %p775_p1 }
 0x212   : > { %p394_p8 = pneg %p393_p5 }
 0x214   : > { %541 = dma.done.wait (%p394_p8), %s284_s6, 128  }
 0x215   : > { %543 = vsyncadd (%p394_p8), %s284_s6, 4294967168  ;;  %s293_s8 = scalar_lea.sflag [#allocation7], %s283_s23 }
 0x216   : > { %545 = dma.done.wait (%p394_p8), %s293_s8, 16  }
 0x217   : > { %547 = vsyncadd (%p394_p8), %s293_s8, 4294967280  ;;  %p20_p12 = scmp.ge.s32.totalorder %s614_s18, 4   ;;  %s777_s12 = smov %s554_s13 }
 0x218   : > { %s778_s13 = smov %s558_s14  ;;  %s779_s14 = smov %s626_s21 }
 0x219   : > { %s780_s15 = smov %s614_s18  ;;  %22 = sbr.rel (!%p20_p12) target bundleno = 7 (0x7), region = 90 }
 0x21e   :  { %297 = vsyncpa [#allocation3], 1 }
 0x21f   :  { %299 = vsyncpa [#allocation3 + $0x1], 1 }
 0x220   :  { %300 = vsyncpa [#allocation4], 1 }
 0x221   :  { %302 = vsyncpa [#allocation4 + $0x1], 1 }
 0x222   :  { %303 = vsyncpa [#allocation7], 1 }
 0x223   :  { %305 = vsyncpa [#allocation7 + $0x1], 1 }

</bundles_post_ra>
